<compile_context>
chip_gen: v6e
topology: v6e:2x2x1
jax: 0.10.0
libtpu: 0.0.40
codegen_flags: <defaults>
</compile_context>

<pallas_src>
import random
import numpy as np
import jax
import jax.numpy as jnp
from jax.experimental import pallas as pl
from jax.experimental.pallas import tpu as pltpu

BATCH_SIZE = 8
MARGIN = 0.5


def _triplet_kernel(feats_ref,   # VMEM f32[B, D]  flattened features (single copy)
                    aux_ref,     # VMEM f32[B, 3]  columns: [label, idx1, idx2]
                    out_ref):    # VMEM f32[1, 1]  summed hinged loss
    B = feats_ref.shape[0]

    la = aux_ref[:, 0:1]        # (B, 1) anchor labels
    idx1 = aux_ref[:, 1:2]      # (B, 1) candidate-1 row index (small ints, exact in f32)
    idx2 = aux_ref[:, 2:3]      # (B, 1) candidate-2 row index

    a = feats_ref[...]          # (B, D)

    def gather(sel):
        # Unrolled one-hot row/label gather: for each source row j, select it
        # into every anchor row whose index equals j.  Pure VPU compares +
        # selects on dense vregs; no dynamic indexing.
        rows = jnp.zeros_like(a)          # (B, D)
        labs = jnp.zeros_like(la)         # (B, 1)
        for j in range(B):
            hit = sel == jnp.float32(j)                               # (B, 1) bool
            rows = jnp.where(hit, feats_ref[pl.ds(j, 1), :], rows)    # bcast (1,D)->(B,D)
            labs = jnp.where(hit, aux_ref[pl.ds(j, 1), 0:1], labs)    # bcast (1,1)->(B,1)
        return rows, labs

    # --- Candidate 1: gather and fully consume before touching candidate 2
    #     (keeps peak live vregs low; see perf review). ---
    x1, l1 = gather(idx1)
    diff1 = a - x1
    d1 = jnp.sum(jnp.abs(diff1), axis=1, keepdims=True)   # L1Loss(sum)   (B, 1)
    s1 = jnp.sum(diff1 * diff1, axis=1, keepdims=True)    # MSELoss(sum)  (B, 1)

    # --- Candidate 2. ---
    x2, l2 = gather(idx2)
    diff2 = a - x2
    d2 = jnp.sum(jnp.abs(diff2), axis=1, keepdims=True)
    s2 = jnp.sum(diff2 * diff2, axis=1, keepdims=True)

    # near/far selection exactly as in the module (d1 >= d2 -> swap).
    swap = d1 >= d2
    a2n = jnp.where(swap, s2, s1)
    a2f = jnp.where(swap, s1, s2)
    l_near = jnp.where(swap, l2, l1)
    l_far = jnp.where(swap, l1, l2)

    alpha = (la - l_far) ** 2 - (la - l_near) ** 2
    loss = a2n - a2f + alpha * jnp.float32(MARGIN)
    hinged = jnp.where(loss >= 0.0, loss, jnp.float32(0.0))

    out_ref[...] = jnp.sum(hinged).reshape(1, 1)


def triplet_loss(features, labels, idx1, idx2):
    B = features.shape[0]
    D = int(np.prod(features.shape[1:]))
    feats2d = features.reshape(B, D).astype(jnp.float32)

    # Single tiny auxiliary block: [label, idx1, idx2] per sample.  Indices are
    # exact as f32 (values < BATCH_SIZE), which makes the in-kernel one-hot
    # compare exact.  This replaces the previous three (B,1) label inputs and
    # the two wrapper-side jnp.take feature gathers.
    aux = jnp.stack(
        [labels.astype(jnp.float32),
         idx1.astype(jnp.float32),
         idx2.astype(jnp.float32)],
        axis=1,
    )  # (B, 3)

    out = pl.pallas_call(
        _triplet_kernel,
        out_shape=jax.ShapeDtypeStruct((1, 1), jnp.float32),
        # No grid: single invocation, full arrays resident in VMEM (32 KiB total).
        in_specs=[pl.BlockSpec(memory_space=pltpu.MemorySpace.VMEM),
                  pl.BlockSpec(memory_space=pltpu.MemorySpace.VMEM)],
        out_specs=pl.BlockSpec(memory_space=pltpu.MemorySpace.VMEM),
    )(feats2d, aux)
    return out[0, 0]


triplet_loss_jit = jax.jit(triplet_loss)


def _sample_indices(batch_size, seed=0):
    # Reproduce the module's host-side sampling exactly:
    # random.sample(range(1, BATCH_SIZE), 2) per sample (distinct pair, may equal i).
    # TODO(synk): random.sample has no in-kernel equivalent; indices are drawn on host.
    rng = random.Random(seed)
    idx1 = np.zeros((batch_size,), dtype=np.int32)
    idx2 = np.zeros((batch_size,), dtype=np.int32)
    for i in range(batch_size):
        a, b = rng.sample(range(1, batch_size), 2)
        idx1[i], idx2[i] = a, b
    return idx1, idx2


def _reference(features, labels, idx1, idx2, m=MARGIN):
    B = features.shape[0]
    feats = np.asarray(features).reshape(B, -1).astype(np.float64)
    lab = np.asarray(labels).astype(np.float64)
    total = 0.0
    for i in range(B):
        i1, i2 = int(idx1[i]), int(idx2[i])
        d1 = np.sum(np.abs(feats[i] - feats[i1]))   # L1(sum) on features
        d2 = np.sum(np.abs(feats[i] - feats[i2]))
        if d1 >= d2:
            near, far = i2, i1
        else:
            near, far = i1, i2
        a2n = np.sum((feats[i] - feats[near]) ** 2)
        a2f = np.sum((feats[i] - feats[far]) ** 2)
        alpha = abs(lab[i] - lab[far]) ** 2 - abs(lab[i] - lab[near]) ** 2
        loss = a2n - a2f + alpha * m
        if loss >= 0:
            total += loss
    return total


if __name__ == "__main__":
    key = jax.random.PRNGKey(0)
    kf, kl = jax.random.split(key)

    # Per-sample feature map [4, 16, 16] -> D = 1024 after flattening.
    features = jax.random.normal(kf, (BATCH_SIZE, 4, 16, 16), dtype=jnp.float32)
    labels = jax.random.uniform(kl, (BATCH_SIZE,), dtype=jnp.float32)

    idx1_np, idx2_np = _sample_indices(BATCH_SIZE, seed=0)
    idx1 = jnp.asarray(idx1_np, dtype=jnp.int32)
    idx2 = jnp.asarray(idx2_np, dtype=jnp.int32)

    out = triplet_loss_jit(features, labels, idx1, idx2)
    out = jax.block_until_ready(out)

    ref = _reference(features, labels, idx1_np, idx2_np)
    assert np.allclose(float(out), ref, rtol=1e-4, atol=1e-2), (float(out), ref)

    print("KERNEL_OK")
</pallas_src>

<mosaic_0001>
module attributes {stable_mosaic.version = 11 : i64} {
  func.func @_triplet_kernel(%arg0: memref<8x1024xf32, #tpu.memory_space<vmem>>, %arg1: memref<8x3xf32, #tpu.memory_space<vmem>>, %arg2: memref<1x1xf32, #tpu.memory_space<vmem>>) attributes {dimension_semantics = [], scalar_prefetch = 0 : i64, scratch_operands = 0 : i64, tpu.core_type = #tpu.core_type<tc>} {
    %c0 = arith.constant 0 : index
    %c0_0 = arith.constant 0 : index
    %0 = vector.load %arg1[%c0, %c0_0] : memref<8x3xf32, #tpu.memory_space<vmem>>, vector<8x1xf32>
    %c0_1 = arith.constant 0 : index
    %c1 = arith.constant 1 : index
    %1 = vector.load %arg1[%c0_1, %c1] : memref<8x3xf32, #tpu.memory_space<vmem>>, vector<8x1xf32>
    %c0_2 = arith.constant 0 : index
    %c2 = arith.constant 2 : index
    %2 = vector.load %arg1[%c0_2, %c2] : memref<8x3xf32, #tpu.memory_space<vmem>>, vector<8x1xf32>
    %c0_3 = arith.constant 0 : index
    %c0_4 = arith.constant 0 : index
    %3 = vector.load %arg0[%c0_3, %c0_4] : memref<8x1024xf32, #tpu.memory_space<vmem>>, vector<8x1024xf32>
    %cst = arith.constant 0.000000e+00 : f32
    %4 = vector.broadcast %cst : f32 to vector<8x1024xf32>
    %cst_5 = arith.constant 0.000000e+00 : f32
    %5 = vector.broadcast %cst_5 : f32 to vector<8x1xf32>
    %cst_6 = arith.constant 0.000000e+00 : f32
    %6 = vector.broadcast %cst_6 : f32 to vector<8x1xf32>
    %7 = arith.cmpf oeq, %1, %6 : vector<8x1xf32>
    %c0_7 = arith.constant 0 : index
    %c0_8 = arith.constant 0 : index
    %8 = vector.load %arg0[%c0_7, %c0_8] : memref<8x1024xf32, #tpu.memory_space<vmem>>, vector<1x1024xf32>
    %9 = vector.shape_cast %7 : vector<8x1xi1> to vector<8x1xi1>
    %10 = vector.broadcast %9 : vector<8x1xi1> to vector<8x1024xi1>
    %11 = vector.shape_cast %8 : vector<1x1024xf32> to vector<1x1024xf32>
    %12 = vector.broadcast %11 : vector<1x1024xf32> to vector<8x1024xf32>
    %13 = arith.select %10, %12, %4 : vector<8x1024xi1>, vector<8x1024xf32>
    %c0_9 = arith.constant 0 : index
    %c0_10 = arith.constant 0 : index
    %14 = vector.load %arg1[%c0_9, %c0_10] : memref<8x3xf32, #tpu.memory_space<vmem>>, vector<1x1xf32>
    %15 = vector.shape_cast %14 : vector<1x1xf32> to vector<1x1xf32>
    %16 = vector.broadcast %15 : vector<1x1xf32> to vector<8x1xf32>
    %17 = arith.select %7, %16, %5 : vector<8x1xi1>, vector<8x1xf32>
    %cst_11 = arith.constant 1.000000e+00 : f32
    %18 = vector.broadcast %cst_11 : f32 to vector<8x1xf32>
    %19 = arith.cmpf oeq, %1, %18 : vector<8x1xf32>
    %c1_12 = arith.constant 1 : index
    %c0_13 = arith.constant 0 : index
    %20 = vector.load %arg0[%c1_12, %c0_13] : memref<8x1024xf32, #tpu.memory_space<vmem>>, vector<1x1024xf32>
    %21 = vector.shape_cast %19 : vector<8x1xi1> to vector<8x1xi1>
    %22 = vector.broadcast %21 : vector<8x1xi1> to vector<8x1024xi1>
    %23 = vector.shape_cast %20 : vector<1x1024xf32> to vector<1x1024xf32>
    %24 = vector.broadcast %23 : vector<1x1024xf32> to vector<8x1024xf32>
    %25 = arith.select %22, %24, %13 : vector<8x1024xi1>, vector<8x1024xf32>
    %c1_14 = arith.constant 1 : index
    %c0_15 = arith.constant 0 : index
    %26 = vector.load %arg1[%c1_14, %c0_15] : memref<8x3xf32, #tpu.memory_space<vmem>>, vector<1x1xf32>
    %27 = vector.shape_cast %26 : vector<1x1xf32> to vector<1x1xf32>
    %28 = vector.broadcast %27 : vector<1x1xf32> to vector<8x1xf32>
    %29 = arith.select %19, %28, %17 : vector<8x1xi1>, vector<8x1xf32>
    %cst_16 = arith.constant 2.000000e+00 : f32
    %30 = vector.broadcast %cst_16 : f32 to vector<8x1xf32>
    %31 = arith.cmpf oeq, %1, %30 : vector<8x1xf32>
    %c2_17 = arith.constant 2 : index
    %c0_18 = arith.constant 0 : index
    %32 = vector.load %arg0[%c2_17, %c0_18] : memref<8x1024xf32, #tpu.memory_space<vmem>>, vector<1x1024xf32>
    %33 = vector.shape_cast %31 : vector<8x1xi1> to vector<8x1xi1>
    %34 = vector.broadcast %33 : vector<8x1xi1> to vector<8x1024xi1>
    %35 = vector.shape_cast %32 : vector<1x1024xf32> to vector<1x1024xf32>
    %36 = vector.broadcast %35 : vector<1x1024xf32> to vector<8x1024xf32>
    %37 = arith.select %34, %36, %25 : vector<8x1024xi1>, vector<8x1024xf32>
    %c2_19 = arith.constant 2 : index
    %c0_20 = arith.constant 0 : index
    %38 = vector.load %arg1[%c2_19, %c0_20] : memref<8x3xf32, #tpu.memory_space<vmem>>, vector<1x1xf32>
    %39 = vector.shape_cast %38 : vector<1x1xf32> to vector<1x1xf32>
    %40 = vector.broadcast %39 : vector<1x1xf32> to vector<8x1xf32>
    %41 = arith.select %31, %40, %29 : vector<8x1xi1>, vector<8x1xf32>
    %cst_21 = arith.constant 3.000000e+00 : f32
    %42 = vector.broadcast %cst_21 : f32 to vector<8x1xf32>
    %43 = arith.cmpf oeq, %1, %42 : vector<8x1xf32>
    %c3 = arith.constant 3 : index
    %c0_22 = arith.constant 0 : index
    %44 = vector.load %arg0[%c3, %c0_22] : memref<8x1024xf32, #tpu.memory_space<vmem>>, vector<1x1024xf32>
    %45 = vector.shape_cast %43 : vector<8x1xi1> to vector<8x1xi1>
    %46 = vector.broadcast %45 : vector<8x1xi1> to vector<8x1024xi1>
    %47 = vector.shape_cast %44 : vector<1x1024xf32> to vector<1x1024xf32>
    %48 = vector.broadcast %47 : vector<1x1024xf32> to vector<8x1024xf32>
    %49 = arith.select %46, %48, %37 : vector<8x1024xi1>, vector<8x1024xf32>
    %c3_23 = arith.constant 3 : index
    %c0_24 = arith.constant 0 : index
    %50 = vector.load %arg1[%c3_23, %c0_24] : memref<8x3xf32, #tpu.memory_space<vmem>>, vector<1x1xf32>
    %51 = vector.shape_cast %50 : vector<1x1xf32> to vector<1x1xf32>
    %52 = vector.broadcast %51 : vector<1x1xf32> to vector<8x1xf32>
    %53 = arith.select %43, %52, %41 : vector<8x1xi1>, vector<8x1xf32>
    %cst_25 = arith.constant 4.000000e+00 : f32
    %54 = vector.broadcast %cst_25 : f32 to vector<8x1xf32>
    %55 = arith.cmpf oeq, %1, %54 : vector<8x1xf32>
    %c4 = arith.constant 4 : index
    %c0_26 = arith.constant 0 : index
    %56 = vector.load %arg0[%c4, %c0_26] : memref<8x1024xf32, #tpu.memory_space<vmem>>, vector<1x1024xf32>
    %57 = vector.shape_cast %55 : vector<8x1xi1> to vector<8x1xi1>
    %58 = vector.broadcast %57 : vector<8x1xi1> to vector<8x1024xi1>
    %59 = vector.shape_cast %56 : vector<1x1024xf32> to vector<1x1024xf32>
    %60 = vector.broadcast %59 : vector<1x1024xf32> to vector<8x1024xf32>
    %61 = arith.select %58, %60, %49 : vector<8x1024xi1>, vector<8x1024xf32>
    %c4_27 = arith.constant 4 : index
    %c0_28 = arith.constant 0 : index
    %62 = vector.load %arg1[%c4_27, %c0_28] : memref<8x3xf32, #tpu.memory_space<vmem>>, vector<1x1xf32>
    %63 = vector.shape_cast %62 : vector<1x1xf32> to vector<1x1xf32>
    %64 = vector.broadcast %63 : vector<1x1xf32> to vector<8x1xf32>
    %65 = arith.select %55, %64, %53 : vector<8x1xi1>, vector<8x1xf32>
    %cst_29 = arith.constant 5.000000e+00 : f32
    %66 = vector.broadcast %cst_29 : f32 to vector<8x1xf32>
    %67 = arith.cmpf oeq, %1, %66 : vector<8x1xf32>
    %c5 = arith.constant 5 : index
    %c0_30 = arith.constant 0 : index
    %68 = vector.load %arg0[%c5, %c0_30] : memref<8x1024xf32, #tpu.memory_space<vmem>>, vector<1x1024xf32>
    %69 = vector.shape_cast %67 : vector<8x1xi1> to vector<8x1xi1>
    %70 = vector.broadcast %69 : vector<8x1xi1> to vector<8x1024xi1>
    %71 = vector.shape_cast %68 : vector<1x1024xf32> to vector<1x1024xf32>
    %72 = vector.broadcast %71 : vector<1x1024xf32> to vector<8x1024xf32>
    %73 = arith.select %70, %72, %61 : vector<8x1024xi1>, vector<8x1024xf32>
    %c5_31 = arith.constant 5 : index
    %c0_32 = arith.constant 0 : index
    %74 = vector.load %arg1[%c5_31, %c0_32] : memref<8x3xf32, #tpu.memory_space<vmem>>, vector<1x1xf32>
    %75 = vector.shape_cast %74 : vector<1x1xf32> to vector<1x1xf32>
    %76 = vector.broadcast %75 : vector<1x1xf32> to vector<8x1xf32>
    %77 = arith.select %67, %76, %65 : vector<8x1xi1>, vector<8x1xf32>
    %cst_33 = arith.constant 6.000000e+00 : f32
    %78 = vector.broadcast %cst_33 : f32 to vector<8x1xf32>
    %79 = arith.cmpf oeq, %1, %78 : vector<8x1xf32>
    %c6 = arith.constant 6 : index
    %c0_34 = arith.constant 0 : index
    %80 = vector.load %arg0[%c6, %c0_34] : memref<8x1024xf32, #tpu.memory_space<vmem>>, vector<1x1024xf32>
    %81 = vector.shape_cast %79 : vector<8x1xi1> to vector<8x1xi1>
    %82 = vector.broadcast %81 : vector<8x1xi1> to vector<8x1024xi1>
    %83 = vector.shape_cast %80 : vector<1x1024xf32> to vector<1x1024xf32>
    %84 = vector.broadcast %83 : vector<1x1024xf32> to vector<8x1024xf32>
    %85 = arith.select %82, %84, %73 : vector<8x1024xi1>, vector<8x1024xf32>
    %c6_35 = arith.constant 6 : index
    %c0_36 = arith.constant 0 : index
    %86 = vector.load %arg1[%c6_35, %c0_36] : memref<8x3xf32, #tpu.memory_space<vmem>>, vector<1x1xf32>
    %87 = vector.shape_cast %86 : vector<1x1xf32> to vector<1x1xf32>
    %88 = vector.broadcast %87 : vector<1x1xf32> to vector<8x1xf32>
    %89 = arith.select %79, %88, %77 : vector<8x1xi1>, vector<8x1xf32>
    %cst_37 = arith.constant 7.000000e+00 : f32
    %90 = vector.broadcast %cst_37 : f32 to vector<8x1xf32>
    %91 = arith.cmpf oeq, %1, %90 : vector<8x1xf32>
    %c7 = arith.constant 7 : index
    %c0_38 = arith.constant 0 : index
    %92 = vector.load %arg0[%c7, %c0_38] : memref<8x1024xf32, #tpu.memory_space<vmem>>, vector<1x1024xf32>
    %93 = vector.shape_cast %91 : vector<8x1xi1> to vector<8x1xi1>
    %94 = vector.broadcast %93 : vector<8x1xi1> to vector<8x1024xi1>
    %95 = vector.shape_cast %92 : vector<1x1024xf32> to vector<1x1024xf32>
    %96 = vector.broadcast %95 : vector<1x1024xf32> to vector<8x1024xf32>
    %97 = arith.select %94, %96, %85 : vector<8x1024xi1>, vector<8x1024xf32>
    %c7_39 = arith.constant 7 : index
    %c0_40 = arith.constant 0 : index
    %98 = vector.load %arg1[%c7_39, %c0_40] : memref<8x3xf32, #tpu.memory_space<vmem>>, vector<1x1xf32>
    %99 = vector.shape_cast %98 : vector<1x1xf32> to vector<1x1xf32>
    %100 = vector.broadcast %99 : vector<1x1xf32> to vector<8x1xf32>
    %101 = arith.select %91, %100, %89 : vector<8x1xi1>, vector<8x1xf32>
    %102 = arith.subf %3, %97 : vector<8x1024xf32>
    %103 = math.absf %102 : vector<8x1024xf32>
    %cst_41 = arith.constant dense<0.000000e+00> : vector<8xf32>
    %104 = vector.multi_reduction <add>, %103, %cst_41 [1] : vector<8x1024xf32> to vector<8xf32>
    %105 = vector.shape_cast %104 : vector<8xf32> to vector<8x1xf32>
    %106 = arith.mulf %102, %102 : vector<8x1024xf32>
    %cst_42 = arith.constant dense<0.000000e+00> : vector<8xf32>
    %107 = vector.multi_reduction <add>, %106, %cst_42 [1] : vector<8x1024xf32> to vector<8xf32>
    %108 = vector.shape_cast %107 : vector<8xf32> to vector<8x1xf32>
    %cst_43 = arith.constant 0.000000e+00 : f32
    %109 = vector.broadcast %cst_43 : f32 to vector<8x1024xf32>
    %cst_44 = arith.constant 0.000000e+00 : f32
    %110 = vector.broadcast %cst_44 : f32 to vector<8x1xf32>
    %cst_45 = arith.constant 0.000000e+00 : f32
    %111 = vector.broadcast %cst_45 : f32 to vector<8x1xf32>
    %112 = arith.cmpf oeq, %2, %111 : vector<8x1xf32>
    %c0_46 = arith.constant 0 : index
    %c0_47 = arith.constant 0 : index
    %113 = vector.load %arg0[%c0_46, %c0_47] : memref<8x1024xf32, #tpu.memory_space<vmem>>, vector<1x1024xf32>
    %114 = vector.shape_cast %112 : vector<8x1xi1> to vector<8x1xi1>
    %115 = vector.broadcast %114 : vector<8x1xi1> to vector<8x1024xi1>
    %116 = vector.shape_cast %113 : vector<1x1024xf32> to vector<1x1024xf32>
    %117 = vector.broadcast %116 : vector<1x1024xf32> to vector<8x1024xf32>
    %118 = arith.select %115, %117, %109 : vector<8x1024xi1>, vector<8x1024xf32>
    %c0_48 = arith.constant 0 : index
    %c0_49 = arith.constant 0 : index
    %119 = vector.load %arg1[%c0_48, %c0_49] : memref<8x3xf32, #tpu.memory_space<vmem>>, vector<1x1xf32>
    %120 = vector.shape_cast %119 : vector<1x1xf32> to vector<1x1xf32>
    %121 = vector.broadcast %120 : vector<1x1xf32> to vector<8x1xf32>
    %122 = arith.select %112, %121, %110 : vector<8x1xi1>, vector<8x1xf32>
    %cst_50 = arith.constant 1.000000e+00 : f32
    %123 = vector.broadcast %cst_50 : f32 to vector<8x1xf32>
    %124 = arith.cmpf oeq, %2, %123 : vector<8x1xf32>
    %c1_51 = arith.constant 1 : index
    %c0_52 = arith.constant 0 : index
    %125 = vector.load %arg0[%c1_51, %c0_52] : memref<8x1024xf32, #tpu.memory_space<vmem>>, vector<1x1024xf32>
    %126 = vector.shape_cast %124 : vector<8x1xi1> to vector<8x1xi1>
    %127 = vector.broadcast %126 : vector<8x1xi1> to vector<8x1024xi1>
    %128 = vector.shape_cast %125 : vector<1x1024xf32> to vector<1x1024xf32>
    %129 = vector.broadcast %128 : vector<1x1024xf32> to vector<8x1024xf32>
    %130 = arith.select %127, %129, %118 : vector<8x1024xi1>, vector<8x1024xf32>
    %c1_53 = arith.constant 1 : index
    %c0_54 = arith.constant 0 : index
    %131 = vector.load %arg1[%c1_53, %c0_54] : memref<8x3xf32, #tpu.memory_space<vmem>>, vector<1x1xf32>
    %132 = vector.shape_cast %131 : vector<1x1xf32> to vector<1x1xf32>
    %133 = vector.broadcast %132 : vector<1x1xf32> to vector<8x1xf32>
    %134 = arith.select %124, %133, %122 : vector<8x1xi1>, vector<8x1xf32>
    %cst_55 = arith.constant 2.000000e+00 : f32
    %135 = vector.broadcast %cst_55 : f32 to vector<8x1xf32>
    %136 = arith.cmpf oeq, %2, %135 : vector<8x1xf32>
    %c2_56 = arith.constant 2 : index
    %c0_57 = arith.constant 0 : index
    %137 = vector.load %arg0[%c2_56, %c0_57] : memref<8x1024xf32, #tpu.memory_space<vmem>>, vector<1x1024xf32>
    %138 = vector.shape_cast %136 : vector<8x1xi1> to vector<8x1xi1>
    %139 = vector.broadcast %138 : vector<8x1xi1> to vector<8x1024xi1>
    %140 = vector.shape_cast %137 : vector<1x1024xf32> to vector<1x1024xf32>
    %141 = vector.broadcast %140 : vector<1x1024xf32> to vector<8x1024xf32>
    %142 = arith.select %139, %141, %130 : vector<8x1024xi1>, vector<8x1024xf32>
    %c2_58 = arith.constant 2 : index
    %c0_59 = arith.constant 0 : index
    %143 = vector.load %arg1[%c2_58, %c0_59] : memref<8x3xf32, #tpu.memory_space<vmem>>, vector<1x1xf32>
    %144 = vector.shape_cast %143 : vector<1x1xf32> to vector<1x1xf32>
    %145 = vector.broadcast %144 : vector<1x1xf32> to vector<8x1xf32>
    %146 = arith.select %136, %145, %134 : vector<8x1xi1>, vector<8x1xf32>
    %cst_60 = arith.constant 3.000000e+00 : f32
    %147 = vector.broadcast %cst_60 : f32 to vector<8x1xf32>
    %148 = arith.cmpf oeq, %2, %147 : vector<8x1xf32>
    %c3_61 = arith.constant 3 : index
    %c0_62 = arith.constant 0 : index
    %149 = vector.load %arg0[%c3_61, %c0_62] : memref<8x1024xf32, #tpu.memory_space<vmem>>, vector<1x1024xf32>
    %150 = vector.shape_cast %148 : vector<8x1xi1> to vector<8x1xi1>
    %151 = vector.broadcast %150 : vector<8x1xi1> to vector<8x1024xi1>
    %152 = vector.shape_cast %149 : vector<1x1024xf32> to vector<1x1024xf32>
    %153 = vector.broadcast %152 : vector<1x1024xf32> to vector<8x1024xf32>
    %154 = arith.select %151, %153, %142 : vector<8x1024xi1>, vector<8x1024xf32>
    %c3_63 = arith.constant 3 : index
    %c0_64 = arith.constant 0 : index
    %155 = vector.load %arg1[%c3_63, %c0_64] : memref<8x3xf32, #tpu.memory_space<vmem>>, vector<1x1xf32>
    %156 = vector.shape_cast %155 : vector<1x1xf32> to vector<1x1xf32>
    %157 = vector.broadcast %156 : vector<1x1xf32> to vector<8x1xf32>
    %158 = arith.select %148, %157, %146 : vector<8x1xi1>, vector<8x1xf32>
    %cst_65 = arith.constant 4.000000e+00 : f32
    %159 = vector.broadcast %cst_65 : f32 to vector<8x1xf32>
    %160 = arith.cmpf oeq, %2, %159 : vector<8x1xf32>
    %c4_66 = arith.constant 4 : index
    %c0_67 = arith.constant 0 : index
    %161 = vector.load %arg0[%c4_66, %c0_67] : memref<8x1024xf32, #tpu.memory_space<vmem>>, vector<1x1024xf32>
    %162 = vector.shape_cast %160 : vector<8x1xi1> to vector<8x1xi1>
    %163 = vector.broadcast %162 : vector<8x1xi1> to vector<8x1024xi1>
    %164 = vector.shape_cast %161 : vector<1x1024xf32> to vector<1x1024xf32>
    %165 = vector.broadcast %164 : vector<1x1024xf32> to vector<8x1024xf32>
    %166 = arith.select %163, %165, %154 : vector<8x1024xi1>, vector<8x1024xf32>
    %c4_68 = arith.constant 4 : index
    %c0_69 = arith.constant 0 : index
    %167 = vector.load %arg1[%c4_68, %c0_69] : memref<8x3xf32, #tpu.memory_space<vmem>>, vector<1x1xf32>
    %168 = vector.shape_cast %167 : vector<1x1xf32> to vector<1x1xf32>
    %169 = vector.broadcast %168 : vector<1x1xf32> to vector<8x1xf32>
    %170 = arith.select %160, %169, %158 : vector<8x1xi1>, vector<8x1xf32>
    %cst_70 = arith.constant 5.000000e+00 : f32
    %171 = vector.broadcast %cst_70 : f32 to vector<8x1xf32>
    %172 = arith.cmpf oeq, %2, %171 : vector<8x1xf32>
    %c5_71 = arith.constant 5 : index
    %c0_72 = arith.constant 0 : index
    %173 = vector.load %arg0[%c5_71, %c0_72] : memref<8x1024xf32, #tpu.memory_space<vmem>>, vector<1x1024xf32>
    %174 = vector.shape_cast %172 : vector<8x1xi1> to vector<8x1xi1>
    %175 = vector.broadcast %174 : vector<8x1xi1> to vector<8x1024xi1>
    %176 = vector.shape_cast %173 : vector<1x1024xf32> to vector<1x1024xf32>
    %177 = vector.broadcast %176 : vector<1x1024xf32> to vector<8x1024xf32>
    %178 = arith.select %175, %177, %166 : vector<8x1024xi1>, vector<8x1024xf32>
    %c5_73 = arith.constant 5 : index
    %c0_74 = arith.constant 0 : index
    %179 = vector.load %arg1[%c5_73, %c0_74] : memref<8x3xf32, #tpu.memory_space<vmem>>, vector<1x1xf32>
    %180 = vector.shape_cast %179 : vector<1x1xf32> to vector<1x1xf32>
    %181 = vector.broadcast %180 : vector<1x1xf32> to vector<8x1xf32>
    %182 = arith.select %172, %181, %170 : vector<8x1xi1>, vector<8x1xf32>
    %cst_75 = arith.constant 6.000000e+00 : f32
    %183 = vector.broadcast %cst_75 : f32 to vector<8x1xf32>
    %184 = arith.cmpf oeq, %2, %183 : vector<8x1xf32>
    %c6_76 = arith.constant 6 : index
    %c0_77 = arith.constant 0 : index
    %185 = vector.load %arg0[%c6_76, %c0_77] : memref<8x1024xf32, #tpu.memory_space<vmem>>, vector<1x1024xf32>
    %186 = vector.shape_cast %184 : vector<8x1xi1> to vector<8x1xi1>
    %187 = vector.broadcast %186 : vector<8x1xi1> to vector<8x1024xi1>
    %188 = vector.shape_cast %185 : vector<1x1024xf32> to vector<1x1024xf32>
    %189 = vector.broadcast %188 : vector<1x1024xf32> to vector<8x1024xf32>
    %190 = arith.select %187, %189, %178 : vector<8x1024xi1>, vector<8x1024xf32>
    %c6_78 = arith.constant 6 : index
    %c0_79 = arith.constant 0 : index
    %191 = vector.load %arg1[%c6_78, %c0_79] : memref<8x3xf32, #tpu.memory_space<vmem>>, vector<1x1xf32>
    %192 = vector.shape_cast %191 : vector<1x1xf32> to vector<1x1xf32>
    %193 = vector.broadcast %192 : vector<1x1xf32> to vector<8x1xf32>
    %194 = arith.select %184, %193, %182 : vector<8x1xi1>, vector<8x1xf32>
    %cst_80 = arith.constant 7.000000e+00 : f32
    %195 = vector.broadcast %cst_80 : f32 to vector<8x1xf32>
    %196 = arith.cmpf oeq, %2, %195 : vector<8x1xf32>
    %c7_81 = arith.constant 7 : index
    %c0_82 = arith.constant 0 : index
    %197 = vector.load %arg0[%c7_81, %c0_82] : memref<8x1024xf32, #tpu.memory_space<vmem>>, vector<1x1024xf32>
    %198 = vector.shape_cast %196 : vector<8x1xi1> to vector<8x1xi1>
    %199 = vector.broadcast %198 : vector<8x1xi1> to vector<8x1024xi1>
    %200 = vector.shape_cast %197 : vector<1x1024xf32> to vector<1x1024xf32>
    %201 = vector.broadcast %200 : vector<1x1024xf32> to vector<8x1024xf32>
    %202 = arith.select %199, %201, %190 : vector<8x1024xi1>, vector<8x1024xf32>
    %c7_83 = arith.constant 7 : index
    %c0_84 = arith.constant 0 : index
    %203 = vector.load %arg1[%c7_83, %c0_84] : memref<8x3xf32, #tpu.memory_space<vmem>>, vector<1x1xf32>
    %204 = vector.shape_cast %203 : vector<1x1xf32> to vector<1x1xf32>
    %205 = vector.broadcast %204 : vector<1x1xf32> to vector<8x1xf32>
    %206 = arith.select %196, %205, %194 : vector<8x1xi1>, vector<8x1xf32>
    %207 = arith.subf %3, %202 : vector<8x1024xf32>
    %208 = math.absf %207 : vector<8x1024xf32>
    %cst_85 = arith.constant dense<0.000000e+00> : vector<8xf32>
    %209 = vector.multi_reduction <add>, %208, %cst_85 [1] : vector<8x1024xf32> to vector<8xf32>
    %210 = vector.shape_cast %209 : vector<8xf32> to vector<8x1xf32>
    %211 = arith.mulf %207, %207 : vector<8x1024xf32>
    %cst_86 = arith.constant dense<0.000000e+00> : vector<8xf32>
    %212 = vector.multi_reduction <add>, %211, %cst_86 [1] : vector<8x1024xf32> to vector<8xf32>
    %213 = vector.shape_cast %212 : vector<8xf32> to vector<8x1xf32>
    %214 = arith.cmpf oge, %105, %210 : vector<8x1xf32>
    %215 = arith.select %214, %213, %108 : vector<8x1xi1>, vector<8x1xf32>
    %216 = arith.select %214, %108, %213 : vector<8x1xi1>, vector<8x1xf32>
    %217 = arith.select %214, %206, %101 : vector<8x1xi1>, vector<8x1xf32>
    %218 = arith.select %214, %101, %206 : vector<8x1xi1>, vector<8x1xf32>
    %219 = arith.subf %0, %218 : vector<8x1xf32>
    %220 = arith.mulf %219, %219 : vector<8x1xf32>
    %221 = arith.subf %0, %217 : vector<8x1xf32>
    %222 = arith.mulf %221, %221 : vector<8x1xf32>
    %223 = arith.subf %220, %222 : vector<8x1xf32>
    %224 = arith.subf %215, %216 : vector<8x1xf32>
    %cst_87 = arith.constant 5.000000e-01 : f32
    %225 = vector.broadcast %cst_87 : f32 to vector<8x1xf32>
    %226 = arith.mulf %223, %225 : vector<8x1xf32>
    %227 = arith.addf %224, %226 : vector<8x1xf32>
    %cst_88 = arith.constant 0.000000e+00 : f32
    %228 = vector.broadcast %cst_88 : f32 to vector<8x1xf32>
    %229 = arith.cmpf oge, %227, %228 : vector<8x1xf32>
    %cst_89 = arith.constant 0.000000e+00 : f32
    %230 = vector.broadcast %cst_89 : f32 to vector<8x1xf32>
    %231 = arith.select %229, %227, %230 : vector<8x1xi1>, vector<8x1xf32>
    %232 = vector.shape_cast %231 : vector<8x1xf32> to vector<1x8x1xf32>
    %cst_90 = arith.constant dense<0.000000e+00> : vector<1xf32>
    %233 = vector.multi_reduction <add>, %232, %cst_90 [1, 2] : vector<1x8x1xf32> to vector<1xf32>
    %234 = vector.shape_cast %233 : vector<1xf32> to vector<1x1x1xf32>
    %235 = vector.extract %234[0, 0, 0] : f32 from vector<1x1x1xf32>
    %236 = vector.broadcast %235 : f32 to vector<1x1xf32>
    %c0_91 = arith.constant 0 : index
    %c0_92 = arith.constant 0 : index
    %237 = vector.load %arg2[%c0_91, %c0_92] : memref<1x1xf32, #tpu.memory_space<vmem>>, vector<1x1xf32>
    tpu.vector_store %arg2[%c0_91, %c0_92], %236 {strides = array<i32>} : memref<1x1xf32, #tpu.memory_space<vmem>>, vector<1x1xf32>,
    return
  }
}

</mosaic_0001>

<bundles_post_ra>
// kernel: triplet_loss.1
= control target key start
LH: loop header
LB: loop body
LE: loop exit
PB: predicated region body
PF: predicated region fallthrough
CT: control target
= control target key end

     0   :  { %v902_v1 = vmov 1   ;;  %v903_v2 = vmov 0   ;;  %v904_v5 = vmov 2   ;;  %s1818_s0 = inlined_call_operand.vmem [shape: f32[8,1024], index: 0, kind: input, shape index: {}]   ;;  %s1819_s1 = inlined_call_operand.vmem [shape: f32[8,3], index: 1, kind: input, shape index: {}]   ;;  %s1820_s2 = inlined_call_operand.hbm [shape: f32[1,1], index: 2, kind: output, shape index: {}]  }
   0x1   :  { %v928_v0 = vld [vmem:[%s1819_s1] sm:$0xff]  ;;  %877 = vset.pattern.permute.xlu1 %v902_v1  ;;  %875 = vset.pattern.permute.xlu0 %v902_v1 }
   0x2   :  { %1847 = vst [vmem:[#allocation5_spill] sm:$0xff] %v928_v0  ;;  %vm89_vm0 = vcmp.eq.f32.partialorder %v928_v0, 1.0  ;;  %vm21_vm1 = vcmp.eq.f32.partialorder %v928_v0, 0.0  ;;  %vm158_vm2 = vcmp.eq.f32.partialorder %v928_v0, 2.0 }
   0x3   :  { %v94_v3 = vsel %vm89_vm0, 1, %v903_v2  ;;  %v25_v4 = vsel %vm21_vm1, 1, %v903_v2  ;;  %v163_v6 = vsel %vm158_vm2, 1, %v903_v2 }
   0x4   :  { %96 = vperm.xlu1 %877, %v94_v3   ;;  %27 = vperm.xlu0 %875, %v25_v4  }
   0x8   :  { %878 = vset.pattern.permute.xlu1 %v904_v5  ;;  %876 = vset.pattern.permute.xlu0 %v904_v5 }
   0x9   :  { %631 = vperm.xlu1 %878, %v94_v3   ;;  %615 = vperm.xlu0 %876, %v25_v4  }
   0xa   :  { %7 = vsyncpa [#allocation3], 0  ;;  %vm227_vm3 = vcmp.eq.f32.partialorder %v928_v0, 3.0  ;;  %vm296_vm4 = vcmp.eq.f32.partialorder %v928_v0, 4.0  ;;  %vm365_vm5 = vcmp.eq.f32.partialorder %v928_v0, 5.0  ;;  %vm434_vm6 = vcmp.eq.f32.partialorder %v928_v0, 6.0 }
   0xb   :  { %v232_v7 = vsel %vm227_vm3, 1, %v903_v2  ;;  %v301_v8 = vsel %vm296_vm4, 1, %v903_v2  ;;  %v370_v9 = vsel %vm365_vm5, 1, %v903_v2  ;;  %v439_v10 = vsel %vm434_vm6, 1, %v903_v2  ;;  %v843_v12 = vld [vmem:[%s1819_s1] ss:$0 sm:$0xff] }
   0xc   :  { %vm1844_vm7 = vcmp.eq.f32.partialorder %v928_v0, 7.0  ;;  %s905_s13 = smov 2   ;;  %s906_s14 = smov 1   ;;  %v846_v13 = vld [vmem:[%s1819_s1 + $0x1] ss:$0 sm:$0xff]  ;;  %v31_v20 = vlaneseq }
   0xd   :  { %879 = vset.pattern.permute.xlu1 %v902_v1  ;;  %647 = vperm.xlu0 %876, %v163_v6   ;;  %v508_v11 = vsel %vm1844_vm7, 1, %v903_v2  ;;  %v849_v14 = vld [vmem:[%s1819_s1 + $0x2] ss:$0 sm:$0xff]  ;;  %v852_v15 = vld [vmem:[%s1819_s1 + $0x3] ss:$0 sm:$0xff]  ;;  %s909_s21 = smov [#allocation2]  }
   0xe   :  { %165 = vperm.xlu1 %879, %v163_v6   ;;  %v855_v16 = vld [vmem:[%s1819_s1 + $0x4] ss:$0 sm:$0xff]  ;;  %v858_v17 = vld [vmem:[%s1819_s1 + $0x5] ss:$0 sm:$0xff]  ;;  %v861_v18 = vld [vmem:[%s1819_s1 + $0x6] ss:$0 sm:$0xff] }
   0xf   :  { %v864_v19 = vld [vmem:[%s1819_s1 + $0x7] ss:$0 sm:$0xff]  ;;  %v32_v21 = vshrl.u32 %v31_v20, 7  ;;  %v22_v22 = vld [vmem:[%s1818_s0] ss:$8 sm:$0xf] }
  0x10   :  { %v23_v23 = vld [vmem:[%s1818_s0] ss:$8 sm:$0xf0]  ;;  %v844_v25 = vld [vmem:[%s1818_s0 + $0x1] ss:$8 sm:$0xf] }
  0x11   :  { %663 = vperm.xlu0 %876, %v232_v7   ;;  %v992_v24 = vsub.s32 0, %v32_v21  ;;  %v24_v26 = vor.u32 %v23_v23, %v22_v22  ;;  %v997_v27 = vsub.s32 1, %v32_v21  ;;  %v999_v28 = vsub.s32 2, %v32_v21  ;;  %v845_v30 = vld [vmem:[%s1818_s0 + $0x1] ss:$8 sm:$0xf0] }
  0x12   :  { %234 = vperm.xlu1 %879, %v232_v7   ;;  %v1001_v29 = vsub.s32 3, %v32_v21  ;;  %v1006_v31 = vsub.s32 4, %v32_v21  ;;  %v1008_v32 = vsub.s32 5, %v32_v21  ;;  %v1010_v33 = vsub.s32 6, %v32_v21  ;;  %s835_s22 = sshll.u32 %s909_s21, 4  ;;  %s836_s22 = int_to_ptr.vmem [resolvable:$true] %s835_s22 }
  0x13   :  { %v1012_v34 = vsub.s32 7, %v32_v21  ;;  %v847_v35 = vld [vmem:[%s1818_s0 + $0x2] ss:$8 sm:$0xf]  ;;  %v93_v37 = vor.u32 %v845_v30, %v844_v25  ;;  %v1021_v38 = vrot.slane %v24_v26, %v992_v24  ;;  %v1030_v41 = vrot.slane %v24_v26, %v997_v27  ;;  %s880_s24 = scalar_lea.vmem %s836_s22, 16  ;;  %s884_s25 = scalar_lea.vmem %s836_s22, 32 }
  0x14   :  { %v848_v36 = vld [vmem:[%s1818_s0 + $0x2] ss:$8 sm:$0xf0]  ;;  %v850_v39 = vld [vmem:[%s1818_s0 + $0x3] ss:$8 sm:$0xf]  ;;  %v1033_v42 = vrot.slane %v24_v26, %v999_v28  ;;  %v1036_v43 = vrot.slane %v24_v26, %v1001_v29  ;;  %v1039_v45 = vrot.slane %v24_v26, %v1006_v31  ;;  %v1042_v46 = vrot.slane %v24_v26, %v1008_v32  ;;  %p881_p0 = scmp.ne.s32.totalorder %s836_s22, %s880_s24  ;;  %p885_p1 = scmp.lt.s32.totalorder %s836_s22, %s836_s22 }
  0x15   :  { %679 = vperm.xlu0 %876, %v301_v8   ;;  %v851_v40 = vld [vmem:[%s1818_s0 + $0x3] ss:$8 sm:$0xf0]  ;;  %v162_v44 = vor.u32 %v848_v36, %v847_v35  ;;  %v1045_v47 = vrot.slane %v24_v26, %v1010_v33  ;;  %v1048_v48 = vrot.slane %v24_v26, %v1012_v34  ;;  %v853_v49 = vld [vmem:[%s1818_s0 + $0x4] ss:$8 sm:$0xf]  ;;  %v1057_v51 = vrot.slane %v93_v37, %v992_v24  ;;  %p886_p2 = scmp.lt.s32.totalorder %s884_s25, %s880_s24 }
  0x16   :  { %303 = vperm.xlu1 %879, %v301_v8   ;;  %v854_v50 = vld [vmem:[%s1818_s0 + $0x4] ss:$8 sm:$0xf0]  ;;  %v1060_v52 = vrot.slane %v93_v37, %v997_v27  ;;  %v1063_v53 = vrot.slane %v93_v37, %v999_v28  ;;  %v231_v54 = vor.u32 %v851_v40, %v850_v39  ;;  %v1066_v55 = vrot.slane %v93_v37, %v1001_v29  ;;  %v856_v63 = vld [vmem:[%s1818_s0 + $0x5] ss:$8 sm:$0xf] }
  0x17   :  { %v1069_v56 = vrot.slane %v93_v37, %v1006_v31  ;;  %v1072_v57 = vrot.slane %v93_v37, %v1008_v32  ;;  %v1075_v58 = vrot.slane %v93_v37, %v1010_v33  ;;  %v1078_v59 = vrot.slane %v93_v37, %v1012_v34  ;;  %v857_v1 = vld [vmem:[%s1818_s0 + $0x5] ss:$8 sm:$0xf0]  ;;  %v862_v21 = vld [vmem:[%s1818_s0 + $0x7] ss:$8 sm:$0xf]  ;;  %p887_p3 = por %p886_p2, %p885_p1 }
  0x18   :  { %v1081_v60 = vrot.slane %v162_v44, %v992_v24  ;;  %v1084_v61 = vrot.slane %v162_v44, %v997_v27  ;;  %v300_v62 = vor.u32 %v854_v50, %v853_v49  ;;  %v1093_v2 = vrot.slane %v162_v44, %v999_v28  ;;  %v863_v22 = vld [vmem:[%s1818_s0 + $0x7] ss:$8 sm:$0xf0] }
  0x19   :  { %695 = vperm.xlu0 %876, %v370_v9   ;;  %v1096_v3 = vrot.slane %v162_v44, %v1001_v29  ;;  %v1099_v4 = vrot.slane %v162_v44, %v1006_v31  ;;  %v1102_v5 = vrot.slane %v162_v44, %v1008_v32  ;;  %v1105_v6 = vrot.slane %v162_v44, %v1010_v33  ;;  %p888_p4 = pnand %p887_p3, %p881_p0 }
  0x1a   :  { %372 = vperm.xlu1 %879, %v370_v9   ;;  %v1108_v7 = vrot.slane %v162_v44, %v1012_v34  ;;  %v1111_v8 = vrot.slane %v231_v54, %v992_v24  ;;  %v1114_v9 = vrot.slane %v231_v54, %v997_v27  ;;  %v1140_v20 = vrot.slane %v300_v62, %v992_v24 }
  0x1b   :  { %v1149_v23 = vrot.slane %v231_v54, %v1012_v34  ;;  %v1152_v25 = vrot.slane %v300_v62, %v997_v27  ;;  %v1155_v26 = vrot.slane %v300_v62, %v999_v28  ;;  %v1158_v30 = vrot.slane %v300_v62, %v1001_v29 }
  0x1c   :  { %v1161_v36 = vrot.slane %v300_v62, %v1006_v31  ;;  %v1164_v37 = vrot.slane %v300_v62, %v1008_v32  ;;  %v1167_v39 = vrot.slane %v300_v62, %v1010_v33  ;;  %v1170_v40 = vrot.slane %v300_v62, %v1012_v34 }
  0x1d   :  { %711 = vperm.xlu0 %876, %v439_v10   ;;  %1848 = vst [vmem:[#allocation6_spill] sm:$0xff] %v1149_v23 }
  0x1e   :  { %441 = vperm.xlu1 %879, %v439_v10   ;;  %v859_v10 = vld [vmem:[%s1818_s0 + $0x6] ss:$8 sm:$0xf]  ;;  %1849 = vst [vmem:[#allocation7_spill] sm:$0xff] %v1167_v39  ;;  %1850 = vst [vmem:[#allocation8_spill] sm:$0xff] %v1170_v40 }
  0x21   :  { %727 = vperm.xlu0 %876, %v508_v11  }
  0x22   :  { %510 = vperm.xlu1 %879, %v508_v11   ;;  %v860_v11 = vld [vmem:[%s1818_s0 + $0x6] ss:$8 sm:$0xf0] }
  0x23   :  { %v438_v35 = vor.u32 %v860_v11, %v859_v10 }
  0x25   :  { %626 = vrot.lane.b32.xlu0 %v843_v12, %s905_s13  ;;  %v1194_v40 = vrot.slane %v438_v35, %v992_v24  ;;  %v1197_v39 = vrot.slane %v438_v35, %v997_v27 }
  0x26   :  { %85 = vrot.lane.b32.xlu1 %v843_v12, %s906_s14  ;;  %v1123_v12 = vrot.slane %v231_v54, %v999_v28 }
  0x29   :  { %642 = vrot.lane.b32.xlu0 %v846_v13, %s905_s13 }
  0x2a   :  { %154 = vrot.lane.b32.xlu1 %v846_v13, %s906_s14  ;;  %v1126_v13 = vrot.slane %v231_v54, %v1001_v29 }
  0x2d   :  { %658 = vrot.lane.b32.xlu0 %v849_v14, %s905_s13 }
  0x2e   :  { %223 = vrot.lane.b32.xlu1 %v849_v14, %s906_s14  ;;  %v1129_v14 = vrot.slane %v231_v54, %v1006_v31 }
  0x31   :  { %674 = vrot.lane.b32.xlu0 %v852_v15, %s905_s13 }
  0x32   :  { %292 = vrot.lane.b32.xlu1 %v852_v15, %s906_s14  ;;  %v369_v15 = vor.u32 %v857_v1, %v856_v63 }
  0x34   :  { %v1173_v44 = vrot.slane %v369_v15, %v992_v24  ;;  %v1176_v49 = vrot.slane %v369_v15, %v997_v27  ;;  %v1179_v50 = vrot.slane %v369_v15, %v999_v28  ;;  %v1182_v63 = vrot.slane %v369_v15, %v1001_v29 }
  0x35   :  { %690 = vrot.lane.b32.xlu0 %v855_v16, %s905_s13  ;;  %v1185_v1 = vrot.slane %v369_v15, %v1006_v31  ;;  %v1188_v10 = vrot.slane %v369_v15, %v1008_v32  ;;  %v1191_v62 = vrot.slane %v369_v15, %v1010_v33 }
  0x36   :  { %361 = vrot.lane.b32.xlu1 %v855_v16, %s906_s14  ;;  %1851 = vst [vmem:[#allocation9_spill] sm:$0xff] %v1182_v63 }
  0x37   :  { %1852 = vst [vmem:[#allocation10_spill] sm:$0xff] %v1185_v1  ;;  %1853 = vst [vmem:[#allocation11_spill] sm:$0xff] %v1188_v10  ;;  %v1206_v10 = vrot.slane %v438_v35, %v1001_v29  ;;  %v1212_v1 = vrot.slane %v438_v35, %v1008_v32 }
  0x38   :  { %1854 = vst [vmem:[#allocation12_spill] sm:$0xff] %v1191_v62  ;;  %v1209_v62 = vrot.slane %v438_v35, %v1006_v31 }
  0x39   :  { %706 = vrot.lane.b32.xlu0 %v858_v17, %s905_s13  ;;  %1857 = vst [vmem:[#allocation15_spill] sm:$0xff] %v1206_v10  ;;  %1859 = vst [vmem:[#allocation17_spill] sm:$0xff] %v1212_v1 }
  0x3a   :  { %430 = vrot.lane.b32.xlu1 %v858_v17, %s906_s14  ;;  %1858 = vst [vmem:[#allocation16_spill] sm:$0xff] %v1209_v62 }
  0x3d   :  { %722 = vrot.lane.b32.xlu0 %v861_v18, %s905_s13 }
  0x3e   :  { %499 = vrot.lane.b32.xlu1 %v861_v18, %s906_s14  ;;  %v1134_v18 = vrot.slane %v231_v54, %v1008_v32 }
  0x41   :  { %738 = vrot.lane.b32.xlu0 %v864_v19, %s905_s13 }
  0x42   :  { %568 = vrot.lane.b32.xlu1 %v864_v19, %s906_s14  ;;  %v1137_v19 = vrot.slane %v231_v54, %v1010_v33  ;;  %v507_v54 = vor.u32 %v863_v22, %v862_v21  ;;  %v1200_v21 = vrot.slane %v438_v35, %v999_v28  ;;  %v1203_v22 = vrot.slane %v369_v15, %v1012_v34 }
  0x43   :  { %v1224_v15 = vrot.slane %v438_v35, %v1012_v34 }
  0x44   :  { %1855 = vst [vmem:[#allocation13_spill] sm:$0xff] %v1200_v21  ;;  %1856 = vst [vmem:[#allocation14_spill] sm:$0xff] %v1203_v22  ;;  %v1215_v63 = vrot.slane %v507_v54, %v992_v24  ;;  %v1218_v23 = vrot.slane %v507_v54, %v997_v27  ;;  %v1221_v21 = vrot.slane %v438_v35, %v1010_v33 }
  0x45   :  { %1862 = vst [vmem:[#allocation20_spill] sm:$0xff] %v1224_v15  ;;  %v1228_v22 = vrot.slane %v507_v54, %v999_v28  ;;  %v1231_v62 = vrot.slane %v507_v54, %v1001_v29  ;;  %v1234_v24 = vrot.slane %v507_v54, %v1006_v31  ;;  %v1247_v31 = vrot.slane %v507_v54, %v1008_v32 }
  0x46   :  { %1860 = vst [vmem:[#allocation18_spill] sm:$0xff] %v1218_v23  ;;  %1861 = vst [vmem:[#allocation19_spill] sm:$0xff] %v1221_v21  ;;  %v1259_v23 = vrot.slane %v507_v54, %v1012_v34 }
  0x47   :  { %1863 = vst [vmem:[#allocation21_spill] sm:$0xff] %v1228_v22  ;;  %1864 = vst [vmem:[#allocation22_spill] sm:$0xff] %v1231_v62 }
  0x48   :  { %1865 = vst [vmem:[#allocation23_spill] sm:$0xff] %v1234_v24  ;;  %1866 = vst [vmem:[#allocation24_spill] sm:$0xff] %v1247_v31  ;;  %v1250_v24 = vrot.slane %v507_v54, %v1010_v33 }
  0x49   :  { %1868 = vst [vmem:[#allocation26_spill] sm:$0xff] %v1259_v23 }
  0x4a   :  { %1867 = vst [vmem:[#allocation25_spill] sm:$0xff] %v1250_v24 }
  0x7f   :  { %v1131_v16 = vpop.permute.xlu1 %96  ;;  %v28_v17 = vpop.permute.xlu0 %27 }
  0x80   :  { %vm29_vm8 = vcmp.eq.s32.totalorder %v28_v17, 1  ;;  %vm98_vm9 = vcmp.eq.s32.totalorder %v1131_v16, 1 }
  0x81   :  { %v71_v27 = vsel %vm29_vm8, %v1021_v38, 0.0  ;;  %v72_v21 = vsel %vm29_vm8, %v1030_v41, 0.0  ;;  %v73_v35 = vsel %vm29_vm8, %v1033_v42, 0.0  ;;  %v74_v15 = vsel %vm29_vm8, %v1036_v43, 0.0 }
  0x82   :  { %v75_v29 = vsel %vm29_vm8, %v1039_v45, 0.0  ;;  %v76_v62 = vsel %vm29_vm8, %v1042_v46, 0.0  ;;  %v77_v10 = vsel %vm29_vm8, %v1045_v47, 0.0  ;;  %v78_v22 = vsel %vm29_vm8, %v1048_v48, 0.0 }
  0x83   :  { %v140_v32 = vsel %vm98_vm9, %v1057_v51, %v71_v27  ;;  %v141_v33 = vsel %vm98_vm9, %v1060_v52, %v72_v21  ;;  %v142_v24 = vsel %vm98_vm9, %v1063_v53, %v73_v35  ;;  %v143_v17 = vsel %vm98_vm9, %v1066_v55, %v74_v15 }
  0x84   :  { %v632_v11 = vpop.permute.xlu1 %631  ;;  %v616_v0 = vpop.permute.xlu0 %615  ;;  %v144_v27 = vsel %vm98_vm9, %v1069_v56, %v75_v29 }
  0x85   :  { %vm617_vm10 = vcmp.eq.s32.totalorder %v616_v0, 1  ;;  %vm633_vm11 = vcmp.eq.s32.totalorder %v632_v11, 1  ;;  %v147_v0 = vsel %vm98_vm9, %v1078_v59, %v78_v22 }
  0x86   :  { %v618_v34 = vsel %vm617_vm10, %v1021_v38, 0.0  ;;  %v619_v54 = vsel %vm617_vm10, %v1030_v41, 0.0  ;;  %v620_v35 = vsel %vm617_vm10, %v1033_v42, 0.0  ;;  %v621_v23 = vsel %vm617_vm10, %v1036_v43, 0.0 }
  0x87   :  { %v622_v15 = vsel %vm617_vm10, %v1039_v45, 0.0  ;;  %v623_v38 = vsel %vm617_vm10, %v1042_v46, 0.0  ;;  %v624_v41 = vsel %vm617_vm10, %v1045_v47, 0.0  ;;  %v625_v29 = vsel %vm617_vm10, %v1048_v48, 0.0 }
  0x88   :  { %v648_v28 = vpop.permute.xlu0 %647  ;;  %v145_v42 = vsel %vm98_vm9, %v1072_v57, %v76_v62  ;;  %v634_v43 = vsel %vm633_vm11, %v1057_v51, %v618_v34  ;;  %v635_v45 = vsel %vm633_vm11, %v1060_v52, %v619_v54  ;;  %v146_v46 = vsel %vm98_vm9, %v1075_v58, %v77_v10 }
  0x89   :  { %v166_v1 = vpop.permute.xlu1 %165  ;;  %vm649_vm12 = vcmp.eq.s32.totalorder %v648_v28, 1  ;;  %v636_v47 = vsel %vm633_vm11, %v1063_v53, %v620_v35  ;;  %v637_v48 = vsel %vm633_vm11, %v1066_v55, %v621_v23  ;;  %v638_v51 = vsel %vm633_vm11, %v1069_v56, %v622_v15 }
  0x8a   :  { %v639_v52 = vsel %vm633_vm11, %v1072_v57, %v623_v38  ;;  %v640_v10 = vsel %vm633_vm11, %v1075_v58, %v624_v41  ;;  %v641_v16 = vsel %vm633_vm11, %v1078_v59, %v625_v29  ;;  %v650_v53 = vsel %vm649_vm12, %v1081_v60, %v634_v43 }
  0x8b   :  { %vm167_vm13 = vcmp.eq.s32.totalorder %v166_v1, 1  ;;  %v651_v55 = vsel %vm649_vm12, %v1084_v61, %v635_v45  ;;  %v652_v56 = vsel %vm649_vm12, %v1093_v2, %v636_v47  ;;  %v653_v57 = vsel %vm649_vm12, %v1096_v3, %v637_v48 }
  0x8c   :  { %v1280_v21 = vpop.permute.xlu0 %663  ;;  %v654_v58 = vsel %vm649_vm12, %v1099_v4, %v638_v51  ;;  %v655_v59 = vsel %vm649_vm12, %v1102_v5, %v639_v52  ;;  %v656_v23 = vsel %vm649_vm12, %v1105_v6, %v640_v10  ;;  %v657_v11 = vsel %vm649_vm12, %v1108_v7, %v641_v16  ;;  %v1869_v16 = vld [vmem:[#allocation13_spill] sm:$0xff] }
  0x8d   :  { %v1290_v31 = vpop.permute.xlu1 %234  ;;  %vm665_vm14 = vcmp.eq.s32.totalorder %v1280_v21, 1  ;;  %v209_v34 = vsel %vm167_vm13, %v1081_v60, %v140_v32  ;;  %v210_v54 = vsel %vm167_vm13, %v1084_v61, %v141_v33  ;;  %v211_v35 = vsel %vm167_vm13, %v1093_v2, %v142_v24 }
  0x8e   :  { %v212_v15 = vsel %vm167_vm13, %v1096_v3, %v143_v17  ;;  %v213_v28 = vsel %vm167_vm13, %v1099_v4, %v144_v27  ;;  %v214_v41 = vsel %vm167_vm13, %v1102_v5, %v145_v42  ;;  %v215_v60 = vsel %vm167_vm13, %v1105_v6, %v146_v46 }
  0x8f   :  { %vm236_vm15 = vcmp.eq.s32.totalorder %v1290_v31, 1  ;;  %v1363_v2 = vsel %vm167_vm13, %v1108_v7, %v147_v0  ;;  %v666_v3 = vsel %vm665_vm14, %v1111_v8, %v650_v53  ;;  %v667_v4 = vsel %vm665_vm14, %v1114_v9, %v651_v55 }
  0x90   :  { %v1317_v62 = vpop.permute.xlu0 %679  ;;  %v668_v5 = vsel %vm665_vm14, %v1123_v12, %v652_v56  ;;  %v669_v6 = vsel %vm665_vm14, %v1126_v13, %v653_v57  ;;  %v670_v7 = vsel %vm665_vm14, %v1129_v14, %v654_v58  ;;  %v671_v1 = vsel %vm665_vm14, %v1134_v18, %v655_v59  ;;  %v1870_v56 = vld [vmem:[#allocation18_spill] sm:$0xff]  ;;  %v1479_v58 = vld [vmem:[%s1818_s0] sm:$0xff] }
  0x91   :  { %v1325_v22 = vpop.permute.xlu1 %303  ;;  %vm681_vm8 = vcmp.eq.s32.totalorder %v1317_v62, 1  ;;  %v672_v24 = vsel %vm665_vm14, %v1137_v19, %v656_v23  ;;  %v278_v32 = vsel %vm236_vm15, %v1111_v8, %v209_v34  ;;  %v279_v33 = vsel %vm236_vm15, %v1114_v9, %v210_v54  ;;  %v1484_v59 = vld [vmem:[%s1818_s0 + $0x8] sm:$0xff] }
  0x92   :  { %v280_v17 = vsel %vm236_vm15, %v1123_v12, %v211_v35  ;;  %v1401_v29 = vsel %vm236_vm15, %v1126_v13, %v212_v15  ;;  %v1406_v42 = vsel %vm236_vm15, %v1129_v14, %v213_v28  ;;  %v1411_v8 = vsel %vm236_vm15, %v1134_v18, %v214_v41  ;;  %v1871_v23 = vld [vmem:[#allocation6_spill] sm:$0xff]  ;;  %v1872_v54 = vld [vmem:[#allocation9_spill] sm:$0xff]  ;;  %v1873_v41 = vld [vmem:[#allocation7_spill] sm:$0xff] }
  0x93   :  { %vm305_vm9 = vcmp.eq.s32.totalorder %v1325_v22, 1  ;;  %v1419_v12 = vsel %vm236_vm15, %v1137_v19, %v215_v60  ;;  %v682_v13 = vsel %vm681_vm8, %v1140_v20, %v666_v3  ;;  %v683_v14 = vsel %vm681_vm8, %v1152_v25, %v667_v4  ;;  %v1498_v28 = vld [vmem:[%s1818_s0 + $0x10] sm:$0xff]  ;;  %v1874_v3 = vld [vmem:[#allocation21_spill] sm:$0xff] }
  0x94   :  { %v1350_v38 = vpop.permute.xlu0 %695  ;;  %v684_v18 = vsel %vm681_vm8, %v1155_v26, %v668_v5  ;;  %v685_v43 = vsel %vm681_vm8, %v1158_v30, %v669_v6  ;;  %v686_v19 = vsel %vm681_vm8, %v1161_v36, %v670_v7  ;;  %v687_v45 = vsel %vm681_vm8, %v1164_v37, %v671_v1  ;;  %v1876_v5 = vld [vmem:[#allocation15_spill] sm:$0xff] }
  0x95   :  { %v1359_v61 = vpop.permute.xlu1 %372  ;;  %vm697_vm10 = vcmp.eq.s32.totalorder %v1350_v38, 1  ;;  %v347_v46 = vsel %vm305_vm9, %v1140_v20, %v278_v32  ;;  %v348_v0 = vsel %vm305_vm9, %v1152_v25, %v279_v33  ;;  %v349_v47 = vsel %vm305_vm9, %v1155_v26, %v280_v17  ;;  %v1877_v32 = vld [vmem:[#allocation8_spill] sm:$0xff]  ;;  %v1579_v38 = vld [vmem:[%s1818_s0 + $0x28] sm:$0xff] }
  0x96   :  { %v698_v51 = vsel %vm697_vm10, %v1173_v44, %v682_v13  ;;  %v699_v52 = vsel %vm697_vm10, %v1176_v49, %v683_v14  ;;  %vm374_vm12 = vcmp.eq.s32.totalorder %v1359_v61, 1  ;;  %v700_v25 = vsel %vm697_vm10, %v1179_v50, %v684_v18  ;;  %v1882_v18 = vld [vmem:[#allocation11_spill] sm:$0xff] }
  0x97   :  { %v673_v34 = vsel %vm665_vm14, %v1871_v23, %v657_v11  ;;  %v701_v35 = vsel %vm697_vm10, %v1872_v54, %v685_v43  ;;  %v416_v15 = vsel %vm374_vm12, %v1173_v44, %v347_v46  ;;  %v688_v60 = vsel %vm681_vm8, %v1873_v41, %v672_v24  ;;  %v1875_v11 = vld [vmem:[#allocation10_spill] sm:$0xff]  ;;  %v1522_v24 = vld [vmem:[%s1818_s0 + $0x18] sm:$0xff] }
  0x98   :  { %v1396_v27 = vpop.permute.xlu0 %711  ;;  %v702_v4 = vsel %vm697_vm10, %v1875_v11, %v686_v19  ;;  %v417_v44 = vsel %vm374_vm12, %v1176_v49, %v348_v0  ;;  %v689_v33 = vsel %vm681_vm8, %v1877_v32, %v673_v34  ;;  %v1878_v49 = vld [vmem:[#allocation22_spill] sm:$0xff]  ;;  %v703_v43 = vsel %vm697_vm10, %v1882_v18, %v687_v45  ;;  %v1883_v19 = vld [vmem:[#allocation12_spill] sm:$0xff]  ;;  %v1887_v34 = vld [vmem:[#allocation17_spill] sm:$0xff] }
  0x99   :  { %v1414_v9 = vpop.permute.xlu1 %441  ;;  %vm713_vm11 = vcmp.eq.s32.totalorder %v1396_v27, 1  ;;  %v704_v62 = vsel %vm697_vm10, %v1883_v19, %v688_v60  ;;  %v1884_v46 = vld [vmem:[#allocation16_spill] sm:$0xff] }
  0x9a   :  { %v714_v26 = vsel %vm713_vm11, %v1194_v40, %v698_v51  ;;  %v715_v10 = vsel %vm713_vm11, %v1197_v39, %v699_v52  ;;  %vm443_vm7 = vcmp.eq.s32.totalorder %v1414_v9, 1  ;;  %v716_v53 = vsel %vm713_vm11, %v1869_v16, %v700_v25  ;;  %v1553_v52 = vld [vmem:[%s1818_s0 + $0x20] sm:$0xff]  ;;  %v1885_v25 = vld [vmem:[#allocation23_spill] sm:$0xff] }
  0x9b   :  { %v717_v6 = vsel %vm713_vm11, %v1876_v5, %v701_v35  ;;  %v485_v7 = vsel %vm443_vm7, %v1194_v40, %v416_v15  ;;  %v718_v0 = vsel %vm713_vm11, %v1884_v46, %v702_v4  ;;  %v719_v35 = vsel %vm713_vm11, %v1887_v34, %v703_v43  ;;  %v1888_v15 = vld [vmem:[#allocation19_spill] sm:$0xff] }
  0x9c   :  { %v728_v48 = vpop.permute.xlu0 %727  ;;  %v720_v60 = vsel %vm713_vm11, %v1888_v15, %v704_v62  ;;  %v486_v4 = vsel %vm443_vm7, %v1197_v39, %v417_v44  ;;  %v1596_v44 = vld [vmem:[%s1818_s0 + $0x38] sm:$0xff] }
  0x9d   :  { %vm729_vm13 = vcmp.eq.s32.totalorder %v728_v48, 1  ;;  %v1457_v20 = vpop.permute.xlu1 %510 }
  0x9e   :  { %v730_v55 = vsel %vm729_vm13, %v1215_v63, %v714_v26  ;;  %v731_v57 = vsel %vm729_vm13, %v1870_v56, %v715_v10  ;;  %v732_v21 = vsel %vm729_vm13, %v1874_v3, %v716_v53  ;;  %v733_v17 = vsel %vm729_vm13, %v1878_v49, %v717_v6  ;;  %v1584_v6 = vld [vmem:[%s1818_s0 + $0x30] sm:$0xff]  ;;  %s907_s0 = smov 127  }
  0x9f   :  { %v1530_v13 = vsub.f32 %v1479_v58, %v730_v55  ;;  %v1533_v14 = vsub.f32 %v1484_v59, %v731_v57  ;;  %v1547_v51 = vsub.f32 %v1498_v28, %v732_v21  ;;  %vm512_vm14 = vcmp.eq.s32.totalorder %v1457_v20, 1  ;;  %v1886_v55 = vld [vmem:[#allocation14_spill] sm:$0xff] }
  0xa0   :  { %v1535_v40 = vpop.permute.xlu0 %626  ;;  %v734_v45 = vsel %vm729_vm13, %v1885_v25, %v718_v0  ;;  %v705_v57 = vsel %vm697_vm10, %v1886_v55, %v689_v33  ;;  %v1571_v21 = vsub.f32 %v1522_v24, %v733_v17  ;;  %v1889_v33 = vld [vmem:[#allocation20_spill] sm:$0xff]  ;;  %v1891_v0 = vld [vmem:[#allocation25_spill] sm:$0xff]  ;;  %v554_v48 = vsel %vm512_vm14, %v1215_v63, %v485_v7 }
  0xa1   :  { %v1517_v1 = vpop.permute.xlu1 %85  ;;  %1879 = vst [vmem:[#allocation13_spill] sm:$0xff] %v1530_v13  ;;  %1880 = vst [vmem:[#allocation18_spill] sm:$0xff] %v1533_v14  ;;  %v750_v26 = vand.u32 2147483647, %v1530_v13  ;;  %v751_v10 = vand.u32 2147483647, %v1533_v14  ;;  %v721_v43 = vsel %vm713_vm11, %v1889_v33, %v705_v57  ;;  %v736_v39 = vsel %vm729_vm13, %v1891_v0, %v720_v60 }
  0xa2   :  { %1881 = vst [vmem:[#allocation6_spill] sm:$0xff] %v1535_v40  ;;  %v1890_v17 = vld [vmem:[#allocation24_spill] sm:$0xff]  ;;  %v1892_v14 = vld [vmem:[#allocation26_spill] sm:$0xff]  ;;  %v1601_v40 = vsub.f32 %v1553_v52, %v734_v45  ;;  %v752_v27 = vand.u32 2147483647, %v1547_v51  ;;  %v418_v60 = vsel %vm374_vm12, %v1179_v50, %v349_v47  ;;  %v555_v45 = vsel %vm512_vm14, %v1870_v56, %v486_v4 }
  0xa3   :  { %v735_v62 = vsel %vm729_vm13, %v1890_v17, %v719_v35  ;;  %v737_v13 = vsel %vm729_vm13, %v1892_v14, %v721_v43  ;;  %v758_v57 = vadd.f32 %v751_v10, %v750_v26  ;;  %v350_v35 = vsel %vm305_vm9, %v1158_v30, %v1401_v29 }
  0xa4   :  { %v1617_v43 = vpop.permute.xlu0 %642  ;;  %v1622_v10 = vsub.f32 %v1579_v38, %v735_v62  ;;  %v1625_v30 = vsub.f32 %v1584_v6, %v736_v39  ;;  %v753_v50 = vand.u32 2147483647, %v1571_v21  ;;  %v351_v63 = vsel %vm305_vm9, %v1161_v36, %v1406_v42 }
  0xa5   :  { %v1559_v53 = vpop.permute.xlu1 %154  ;;  %v759_v29 = vadd.f32 %v758_v57, %v752_v27  ;;  %v352_v47 = vsel %vm305_vm9, %v1164_v37, %v1411_v8  ;;  %v487_v56 = vsel %vm443_vm7, %v1869_v16, %v418_v60  ;;  %v1640_v7 = vsub.f32 %v1596_v44, %v737_v13 }
  0xa6   :  { %v419_v4 = vsel %vm374_vm12, %v1872_v54, %v350_v35  ;;  %v754_v62 = vand.u32 2147483647, %v1601_v40  ;;  %v556_v36 = vsel %vm512_vm14, %v1874_v3, %v487_v56  ;;  %v420_v37 = vsel %vm374_vm12, %v1875_v11, %v351_v63 }
  0xa7   :  { %v760_v39 = vadd.f32 %v759_v29, %v753_v50  ;;  %v488_v42 = vsel %vm443_vm7, %v1876_v5, %v419_v4  ;;  %v1656_v8 = vsub.f32 %v1479_v58, %v554_v48  ;;  %v1659_v16 = vsub.f32 %v1484_v59, %v555_v45  ;;  %v1893_v4 = vld [vmem:[#allocation5_spill] sm:$0xff] }
  0xa8   :  { %v755_v54 = vand.u32 2147483647, %v1622_v10  ;;  %v756_v13 = vand.u32 2147483647, %v1625_v30  ;;  %v557_v3 = vsel %vm512_vm14, %v1878_v49, %v488_v42  ;;  %v757_v11 = vand.u32 2147483647, %v1640_v7  ;;  %v659_v57 = vpop.permute.xlu0 %658 }
  0xa9   :  { %v1619_v26 = vpop.permute.xlu1 %223  ;;  %v761_v27 = vadd.f32 %v760_v39, %v754_v62  ;;  %v421_v5 = vsel %vm374_vm12, %v1882_v18, %v352_v47  ;;  %v489_v58 = vsel %vm443_vm7, %v1884_v46, %v420_v37  ;;  %v1674_v59 = vsub.f32 %v1498_v28, %v556_v36 }
  0xaa   :  { %v558_v49 = vsel %vm512_vm14, %v1885_v25, %v489_v58  ;;  %v580_v48 = vand.u32 2147483647, %v1656_v8  ;;  %v581_v45 = vand.u32 2147483647, %v1659_v16  ;;  %v285_v18 = vsel %vm236_vm15, %v1871_v23, %v1363_v2 }
  0xab   :  { %v762_v60 = vadd.f32 %v761_v27, %v755_v54  ;;  %v353_v28 = vsel %vm305_vm9, %v1873_v41, %v1419_v12  ;;  %v490_v46 = vsel %vm443_vm7, %v1887_v34, %v421_v5  ;;  %v1693_v25 = vsub.f32 %v1522_v24, %v557_v3  ;;  %v1894_v54 = vld [vmem:[#allocation6_spill] sm:$0xff] }
  0xac   :  { %v354_v29 = vsel %vm305_vm9, %v1877_v32, %v285_v18  ;;  %v422_v31 = vsel %vm374_vm12, %v1883_v19, %v353_v28  ;;  %v559_v2 = vsel %vm512_vm14, %v1890_v17, %v490_v46  ;;  %v1708_v23 = vsub.f32 %v1553_v52, %v558_v49  ;;  %v675_v63 = vpop.permute.xlu0 %674  ;;  %v1897_v28 = vld [vmem:[#allocation18_spill] sm:$0xff] }
  0xad   :  { %v293_v35 = vpop.permute.xlu1 %292  ;;  %v763_v50 = vadd.f32 %v762_v60, %v756_v13  ;;  %v491_v12 = vsel %vm443_vm7, %v1888_v15, %v422_v31  ;;  %v582_v41 = vand.u32 2147483647, %v1674_v59  ;;  %v588_v24 = vadd.f32 %v581_v45, %v580_v48  ;;  %v1896_v45 = vld [vmem:[#allocation13_spill] sm:$0xff] }
  0xae   :  { %v423_v32 = vsel %vm374_vm12, %v1886_v55, %v354_v29  ;;  %v560_v19 = vsel %vm512_vm14, %v1891_v0, %v491_v12  ;;  %v1721_v15 = vsub.f32 %v1579_v38, %v559_v2  ;;  %v583_v52 = vand.u32 2147483647, %v1693_v25 }
  0xaf   :  { %v764_v22 = vadd.f32 %v763_v50, %v757_v11  ;;  %v492_v34 = vsel %vm443_vm7, %v1889_v33, %v423_v32  ;;  %v589_v17 = vadd.f32 %v588_v24, %v582_v41  ;;  %v1728_v55 = vsub.f32 %v1584_v6, %v560_v19 }
  0xb0   :  { %v561_v61 = vsel %vm512_vm14, %v1892_v14, %v492_v34  ;;  %v584_v0 = vand.u32 2147483647, %v1708_v23  ;;  %v585_v38 = vand.u32 2147483647, %v1721_v15  ;;  %v88_v62 = vsel %vm21_vm1, %v1517_v1, 0.0  ;;  %v691_v14 = vpop.permute.xlu0 %690 }
  0xb1   :  { %v362_v47 = vpop.permute.xlu1 %361  ;;  %765 = vadd.xlane.f32.xlu0 %v764_v22  ;;  %v590_v9 = vadd.f32 %v589_v17, %v583_v52  ;;  %v1732_v33 = vsub.f32 %v1596_v44, %v561_v61  ;;  %v586_v39 = vand.u32 2147483647, %v1728_v55  ;;  %v157_v6 = vsel %vm89_vm0, %v1559_v53, %v88_v62 }
  0xb2   :  { %v629_v13 = vsel %vm21_vm1, %v1894_v54, 0.0  ;;  %v226_v1 = vsel %vm158_vm2, %v1619_v26, %v157_v6  ;;  %v767_v18 = vmul.f32 %v1896_v45, %v1896_v45  ;;  %v768_v46 = vmul.f32 %v1897_v28, %v1897_v28 }
  0xb3   :  { %v591_v56 = vadd.f32 %v590_v9, %v584_v0  ;;  %v587_v37 = vand.u32 2147483647, %v1732_v33  ;;  %v645_v11 = vsel %vm89_vm0, %v1617_v43, %v629_v13  ;;  %v295_v53 = vsel %vm227_vm3, %v293_v35, %v226_v1 }
  0xb4   :  { %v707_v27 = vpop.permute.xlu0 %706  ;;  %v661_v5 = vsel %vm158_vm2, %v659_v57, %v645_v11  ;;  %v364_v58 = vsel %vm296_vm4, %v362_v47, %v295_v53  ;;  %vm1895_vm0 = vcmp.eq.f32.partialorder %v1893_v4, 7.0  ;;  %v775_v12 = vadd.f32 %v768_v46, %v767_v18 }
  0xb5   :  { %v592_v20 = vadd.f32 %v591_v56, %v585_v38  ;;  %v431_v36 = vpop.permute.xlu1 %430  ;;  %v677_v26 = vsel %vm227_vm3, %v675_v63, %v661_v5  ;;  %vm1898_vm1 = vmmov %vm1895_vm0  ;;  %v769_v41 = vmul.f32 %v1547_v51, %v1547_v51  ;;  %v770_v22 = vmul.f32 %v1571_v21, %v1571_v21 }
  0xb6   :  { %v433_v48 = vsel %vm365_vm5, %v431_v36, %v364_v58  ;;  %v693_v57 = vsel %vm296_vm4, %v691_v14, %v677_v26  ;;  %v597_v32 = vmul.f32 %v1656_v8, %v1656_v8  ;;  %v598_v19 = vmul.f32 %v1659_v16, %v1659_v16 }
  0xb7   :  { %v593_v44 = vadd.f32 %v592_v20, %v586_v39  ;;  %v709_v29 = vsel %vm365_vm5, %v707_v27, %v693_v57  ;;  %v776_v24 = vadd.f32 %v775_v12, %v769_v41  ;;  %v771_v52 = vmul.f32 %v1601_v40, %v1601_v40 }
  0xb8   :  { %v723_v60 = vpop.permute.xlu0 %722  ;;  %v605_v17 = vadd.f32 %v598_v19, %v597_v32  ;;  %v599_v47 = vmul.f32 %v1674_v59, %v1674_v59  ;;  %v772_v51 = vmul.f32 %v1622_v10, %v1622_v10  ;;  %v600_v8 = vmul.f32 %v1693_v25, %v1693_v25 }
  0xb9   :  { %v594_v42 = vadd.f32 %v593_v44, %v587_v37  ;;  %v500_v3 = vpop.permute.xlu1 %499  ;;  %v725_v31 = vsel %vm434_vm6, %v723_v60, %v709_v29  ;;  %v777_v34 = vadd.f32 %v776_v24, %v770_v22  ;;  %v773_v16 = vmul.f32 %v1625_v30, %v1625_v30 }
  0xba   :  { %v502_v43 = vsel %vm434_vm6, %v500_v3, %v433_v48  ;;  %v606_v61 = vadd.f32 %v605_v17, %v599_v47  ;;  %v601_v40 = vmul.f32 %v1708_v23, %v1708_v23  ;;  %v774_v38 = vmul.f32 %v1640_v7, %v1640_v7 }
  0xbb   :  { %595 = vadd.xlane.f32.xlu1 %v594_v42  ;;  %v778_v63 = vadd.f32 %v777_v34, %v771_v52  ;;  %v602_v10 = vmul.f32 %v1721_v15, %v1721_v15  ;;  %v603_v25 = vmul.f32 %v1728_v55, %v1728_v55  ;;  %v604_v30 = vmul.f32 %v1732_v33, %v1732_v33 }
  0xbc   :  { %v739_v50 = vpop.permute.xlu0 %738  ;;  %v607_v0 = vadd.f32 %v606_v61, %v600_v8  ;;  %vm815_vm3 = vcmask 7168   ;;  %vm827_vm5 = vcmask 0  }
  0xbd   :  { %v569_v49 = vpop.permute.xlu1 %568  ;;  %v741_v2 = vsel %vm1898_vm1, %v739_v50, %v725_v31  ;;  %v779_v21 = vadd.f32 %v778_v63, %v772_v51 }
  0xbe   :  { %v571_v35 = vsel %vm1895_vm0, %v569_v49, %v502_v43  ;;  %v608_v59 = vadd.f32 %v607_v0, %v601_v40 }
  0xbf   :  { %v780_v9 = vadd.f32 %v779_v21, %v773_v16 }
  0xc0   :  { %v609_v62 = vadd.f32 %v608_v59, %v602_v10 }
  0xc1   :  { %v781_v56 = vadd.f32 %v780_v9, %v774_v38 }
  0xc2   :  { %v610_v39 = vadd.f32 %v609_v62, %v603_v25 }
  0xc4   :  { %v611_v20 = vadd.f32 %v610_v39, %v604_v30 }
  0xc7   :  { %788 = vrot.lane.b32.xlu0 %v571_v35, %s906_s14  ;;  %s908_s14 = smov 126  }
  0xcc   :  { %793 = vrot.lane.b32.xlu1 %v741_v2, %s907_s0 }
  0xe6   :  { %782 = vadd.xlane.f32.xlu0 %v781_v56 }
  0xf0   :  { %612 = vadd.xlane.f32.xlu1 %v611_v20 }
 0x13a   :  { %v766_v23 = vpop.xlane.xlu0 %765 }
 0x13e   :  { %v789_v14 = vpop.permute.xlu0 %788 }
 0x144   :  { %v596_v36 = vpop.xlane.xlu1 %595 }
 0x145   :  { %vm784_vm2 = vcmp.ge.f32.partialorder %v596_v36, %v766_v23 }
 0x146   :  { %v791_v7 = vsel %vm784_vm2, %v741_v2, %v789_v14 }
 0x147   :  { %804 = vrot.lane.b32.xlu1 %v791_v7, %s908_s14 }
 0x148   :  { %v794_v15 = vpop.permute.xlu1 %793 }
 0x149   :  { %v796_v6 = vsel %vm784_vm2, %v571_v35, %v794_v15 }
 0x14a   :  { %798 = vrot.lane.b32.xlu0 %v796_v6, %s907_s0 }
 0x16f   :  { %v783_v37 = vpop.xlane.xlu0 %782 }
 0x179   :  { %v613_v55 = vpop.xlane.xlu1 %612 }
 0x17a   :  { %v785_v27 = vsel %vm784_vm2, %v783_v37, %v613_v55  ;;  %v786_v3 = vsel %vm784_vm2, %v613_v55, %v783_v37 }
 0x17b   :  { %v810_v53 = vsub.f32 %v785_v27, %v786_v3 }
 0x1b9   :  { %v805_v44 = vpop.permute.xlu1 %804 }
 0x1ba   :  { %v807_v33 = vsub.f32 %v1893_v4, %v805_v44 }
 0x1bc   :  { %v799_v42 = vpop.permute.xlu0 %798  ;;  %v808_v54 = vmul.f32 %v807_v33, %v807_v33 }
 0x1bd   :  { %v801_v13 = vsub.f32 %v1893_v4, %v799_v42 }
 0x1bf   :  { %v802_v1 = vmul.f32 %v801_v13, %v801_v13 }
 0x1c1   :  { %v809_v11 = vsub.f32 %v802_v1, %v808_v54 }
 0x1c3   :  { %v811_v5 = vmul.f32 0.5, %v809_v11 }
 0x1c5   :  { %v812_v58 = vadd.f32 %v811_v5, %v810_v53 }
 0x1c7   :  { %vm813_vm4 = vcmp.ge.f32.partialorder %v812_v58, 0.0 }
 0x1c8   :  { %v814_v60 = vsel %vm813_vm4, %v812_v58, 0.0 }
 0x1c9   :  { %v816_v49 = vsel %vm815_vm3, %v814_v60, 0.0 }
 0x1ca   :  { %817 = vadd.xlane.f32.xlu1 %v816_v49 }
 0x253   :  { %v818_v26 = vpop.xlane.xlu1 %817 }
 0x254   :  { %v819_v48 = vrot.slane %v818_v26, 4 }
 0x256   :  { %v820_v43 = vadd.f32 %v819_v48, %v818_v26 }
 0x258   :  { %v821_v35 = vrot.slane %v820_v43, 2 }
 0x25a   :  { %v822_v57 = vadd.f32 %v821_v35, %v820_v43 }
 0x25c   :  { %v823_v4 = vrot.slane %v822_v57, 1 }
 0x25e   :  { %v824_v45 = vadd.f32 %v823_v4, %v822_v57 }
 0x260   :  { %865 = vpush %v824_v45 }
 0x291   :  { %s866_s23 = spop %865 }
 0x292   :  { %v826_v18 = vstv %s866_s23 }
 0x293   :  { %828 = vst.msk [vmem:[#allocation2] sm:$0x1] %vm827_vm5, %v826_v18 }
 0x294   :  { %891 = shalt.err (!%p888_p4)
}
 0x295   :  { %838 = dma.vmem_to_hbm [thread:$0]  %s836_s22, 16, %s1820_s2, [#allocation3]  }
 0x296   :  { %900 = dma.done.wait [#allocation3], 16  }
 0x297   :  { %901 = vsyncadd [#allocation3], 4294967280 }
 0x298   :  { %842 = vsyncpa [#allocation3], 1 }

</bundles_post_ra>
